<compile_context>
chip_gen: v7x
topology: tpu7x:2x2x1
jax: 0.10.0
libtpu: 0.0.40
codegen_flags: <defaults>
</compile_context>

<pallas_src>
import functools

import jax
import jax.numpy as jnp
from jax.experimental import pallas as pl
from jax.experimental.pallas import tpu as pltpu


def _round_up(n, m):
    return ((n + m - 1) // m) * m


def _fd_odn_kernel(x_ref,
                   w1_ref, b1_ref,
                   w2_ref, b2_ref,
                   w3_ref, b3_ref,
                   w4_ref, b4_ref,
                   out_ref):
    """One batch tile: trunk (2 layers) + fused classification/regression heads."""

    def dense(a, w_ref, b_ref):
        # MXU matmul with f32 accumulation; bias kept in f32.
        return jnp.dot(a.astype(w_ref.dtype), w_ref[...],
                       preferred_element_type=jnp.float32) + b_ref[...]

    h = jax.nn.sigmoid(dense(x_ref[...], w1_ref, b1_ref))   # g1S
    h = jax.nn.sigmoid(dense(h, w2_ref, b2_ref))            # g2S
    h = jax.nn.sigmoid(dense(h, w3_ref, b3_ref))            # fused [g3C | g3R]
    # fused [g4C | g4R + (K-1)/2 | zero-pad] -> single lane-dense store.
    out_ref[...] = dense(h, w4_ref, b4_ref).astype(out_ref.dtype)


def _pack_params(params, d, M, K, compute_dtype):
    """Zero-pad + fuse the six Linear layers into four lane-aligned matrices."""
    MP = _round_up(M, 128)          # trunk hidden width
    HP = _round_up(2 * M, 128)      # fused head hidden width
    NP = _round_up(K + 1, 128)      # fused output width (lane-dense)
    f32 = jnp.float32

    w1 = jnp.zeros((d, MP), f32).at[:, :M].set(params["w1"])
    b1 = jnp.zeros((1, MP), f32).at[:, :M].set(params["b1"].reshape(1, M))

    w2 = jnp.zeros((MP, MP), f32).at[:M, :M].set(params["w2"])
    b2 = jnp.zeros((1, MP), f32).at[:, :M].set(params["b2"].reshape(1, M))

    w3 = (jnp.zeros((MP, HP), f32)
          .at[:M, :M].set(params["w3c"])
          .at[:M, M:2 * M].set(params["w3r"]))
    b3 = (jnp.zeros((1, HP), f32)
          .at[:, :M].set(params["b3c"].reshape(1, M))
          .at[:, M:2 * M].set(params["b3r"].reshape(1, M)))

    w4 = (jnp.zeros((HP, NP), f32)
          .at[:M, :K].set(params["w4c"])
          .at[M:2 * M, K:K + 1].set(params["w4r"]))
    b4 = (jnp.zeros((1, NP), f32)
          .at[:, :K].set(params["b4c"].reshape(1, K))
          .at[:, K].set(params["b4r"].reshape(()) + (K - 1.0) / 2.0))

    # Only the matmul operands are (optionally) down-cast; biases stay f32.
    w1, w2, w3, w4 = (w.astype(compute_dtype) for w in (w1, w2, w3, w4))
    return (w1, b1, w2, b2, w3, b3, w4, b4), (MP, HP, NP)


def fd_odn_forward(x, params, K, *, compute_dtype=jnp.float32, batch_tile=512):
    """FD_ODN forward as one Pallas TPU kernel.

    Args:
      x: (B, d) input.
      params: dict from init_fd_odn_params (weights stored (in, out)).
      K: number of classes (static python int).
      compute_dtype: matmul operand dtype (use jnp.bfloat16 on v6e/v7x).
      batch_tile: max rows per grid step.

    Returns:
      (gC, gR): (B, K) logits and (B, 1) regression output, float32.
    """
    B, d = x.shape
    M = params["w2"].shape[0]
    packed, (MP, HP, NP) = _pack_params(params, d, M, K, compute_dtype)

    # Batch tile: whole batch if small, otherwise 512-row tiles (8-aligned).
    TB = B if B <= batch_tile else batch_tile
    grid = (pl.cdiv(B, TB),)
    const = lambda i: (0, 0)   # weights/biases: same block every step -> resident

    out = pl.pallas_call(
        _fd_odn_kernel,
        grid=grid,
        in_specs=[
            pl.BlockSpec((TB, d), lambda i: (i, 0)),   # x tile (streamed)
            pl.BlockSpec((d, MP), const),              # w1
            pl.BlockSpec((1, MP), const),              # b1
            pl.BlockSpec((MP, MP), const),             # w2
            pl.BlockSpec((1, MP), const),              # b2
            pl.BlockSpec((MP, HP), const),             # fused w3 = [w3c | w3r]
            pl.BlockSpec((1, HP), const),              # fused b3
            pl.BlockSpec((HP, NP), const),             # fused block-diag w4
            pl.BlockSpec((1, NP), const),              # fused b4 (+(K-1)/2 folded)
        ],
        out_specs=pl.BlockSpec((TB, NP), lambda i: (i, 0)),
        out_shape=jax.ShapeDtypeStruct((B, NP), jnp.float32),
        compiler_params=pltpu.CompilerParams(
            dimension_semantics=("parallel",),          # shard batch across TCs
            vmem_limit_bytes=32 * 1024 * 1024,          # safe on v5e/v6e/v7x
        ),
    )(x.astype(compute_dtype), *packed)

    gC = out[:, :K]
    gR = out[:, K:K + 1]
    return gC, gR


def init_fd_odn_params(key, d, M, K):
    """Deterministic PyTorch-style (uniform +-1/sqrt(fan_in)) initialization."""
    def linear(key, fan_in, fan_out):
        kw, kb = jax.random.split(key)
        bound = 1.0 / jnp.sqrt(float(fan_in))
        w = jax.random.uniform(kw, (fan_in, fan_out), jnp.float32, -bound, bound)
        b = jax.random.uniform(kb, (1, fan_out), jnp.float32, -bound, bound)
        return w, b

    keys = jax.random.split(key, 6)
    w1, b1 = linear(keys[0], d, M)      # g1S
    w2, b2 = linear(keys[1], M, M)      # g2S
    w3c, b3c = linear(keys[2], M, M)    # g3C
    w4c, b4c = linear(keys[3], M, K)    # g4C
    w3r, b3r = linear(keys[4], M, M)    # g3R
    w4r, b4r = linear(keys[5], M, 1)    # g4R
    return dict(w1=w1, b1=b1, w2=w2, b2=b2,
                w3c=w3c, b3c=b3c, w4c=w4c, b4c=b4c,
                w3r=w3r, b3r=b3r, w4r=w4r, b4r=b4r)


def _reference_forward(x, p, K):
    """Pure-JAX reference for a sanity check."""
    gs = jax.nn.sigmoid(x @ p["w1"] + p["b1"])
    gs = jax.nn.sigmoid(gs @ p["w2"] + p["b2"])
    gc = jax.nn.sigmoid(gs @ p["w3c"] + p["b3c"])
    gc = gc @ p["w4c"] + p["b4c"]
    gr = jax.nn.sigmoid(gs @ p["w3r"] + p["b3r"])
    gr = gr @ p["w4r"] + p["b4r"] + (K - 1.0) / 2.0
    return gc, gr


if __name__ == "__main__":
    # Small shapes consistent with the module: x is (batch, d).
    B, d, M, K = 8, 4, 32, 5

    key = jax.random.PRNGKey(0)
    k_params, k_x = jax.random.split(key)
    params = init_fd_odn_params(k_params, d, M, K)
    x = jax.random.normal(k_x, (B, d), dtype=jnp.float32)

    fwd = jax.jit(functools.partial(fd_odn_forward, K=K))
    gC, gR = fwd(x, params)
    jax.block_until_ready((gC, gR))

    # Correctness check vs. pure-JAX reference (f32 path -> tight tolerance).
    gC_ref, gR_ref = _reference_forward(x, params, K)
    assert gC.shape == (B, K) and gR.shape == (B, 1)
    assert jnp.allclose(gC, gC_ref, atol=1e-5, rtol=1e-5)
    assert jnp.allclose(gR, gR_ref, atol=1e-5, rtol=1e-5)

    print("KERNEL_OK")
</pallas_src>

<mosaic_0001>
module attributes {stable_mosaic.version = 11 : i64} {
  func.func @_fd_odn_kernel(%arg0: i32, %arg1: memref<8x4xf32, #tpu.memory_space<vmem>>, %arg2: memref<4x128xf32, #tpu.memory_space<vmem>>, %arg3: memref<1x128xf32, #tpu.memory_space<vmem>>, %arg4: memref<128x128xf32, #tpu.memory_space<vmem>>, %arg5: memref<1x128xf32, #tpu.memory_space<vmem>>, %arg6: memref<128x128xf32, #tpu.memory_space<vmem>>, %arg7: memref<1x128xf32, #tpu.memory_space<vmem>>, %arg8: memref<128x128xf32, #tpu.memory_space<vmem>>, %arg9: memref<1x128xf32, #tpu.memory_space<vmem>>, %arg10: memref<8x128xf32, #tpu.memory_space<vmem>>) attributes {dimension_semantics = [#tpu.dimension_semantics<parallel>], iteration_bounds = array<i64: 1>, scalar_prefetch = 0 : i64, scratch_operands = 0 : i64, tpu.core_type = #tpu.core_type<tc>, window_params = [{transform_indices = @transform_0, window_bounds = array<i64: 8, 4>}, {pipeline_mode = #tpu.pipeline_mode<synchronous>, transform_indices = @transform_1, window_bounds = array<i64: 4, 128>}, {pipeline_mode = #tpu.pipeline_mode<synchronous>, transform_indices = @transform_2, window_bounds = array<i64: 1, 128>}, {pipeline_mode = #tpu.pipeline_mode<synchronous>, transform_indices = @transform_3, window_bounds = array<i64: 128, 128>}, {pipeline_mode = #tpu.pipeline_mode<synchronous>, transform_indices = @transform_4, window_bounds = array<i64: 1, 128>}, {pipeline_mode = #tpu.pipeline_mode<synchronous>, transform_indices = @transform_5, window_bounds = array<i64: 128, 128>}, {pipeline_mode = #tpu.pipeline_mode<synchronous>, transform_indices = @transform_6, window_bounds = array<i64: 1, 128>}, {pipeline_mode = #tpu.pipeline_mode<synchronous>, transform_indices = @transform_7, window_bounds = array<i64: 128, 128>}, {pipeline_mode = #tpu.pipeline_mode<synchronous>, transform_indices = @transform_8, window_bounds = array<i64: 1, 128>}, {transform_indices = @transform_9, window_bounds = array<i64: 8, 128>}]} {
    %c0 = arith.constant 0 : index
    %c0_0 = arith.constant 0 : index
    %0 = vector.load %arg1[%c0, %c0_0] : memref<8x4xf32, #tpu.memory_space<vmem>>, vector<8x4xf32>
    %c0_1 = arith.constant 0 : index
    %c0_2 = arith.constant 0 : index
    %1 = vector.load %arg2[%c0_1, %c0_2] : memref<4x128xf32, #tpu.memory_space<vmem>>, vector<4x128xf32>
    %cst = arith.constant dense<0.000000e+00> : vector<8x128xf32>
    %2 = tpu.matmul %0, %1, %cst {dimension_numbers = #tpu.dot_dimension_numbers<[1], [0], [0], [1], [0, 0, 1, 1], [], []>} : vector<8x4xf32>, vector<4x128xf32>, vector<8x128xf32> -> vector<8x128xf32>
    %c0_3 = arith.constant 0 : index
    %c0_4 = arith.constant 0 : index
    %3 = vector.load %arg3[%c0_3, %c0_4] : memref<1x128xf32, #tpu.memory_space<vmem>>, vector<1x128xf32>
    %4 = vector.broadcast %3 : vector<1x128xf32> to vector<8x128xf32>
    %5 = arith.addf %2, %4 : vector<8x128xf32>
    %6 = arith.negf %5 : vector<8x128xf32>
    %7 = math.exp %6 : vector<8x128xf32>
    %cst_5 = arith.constant 1.000000e+00 : f32
    %8 = vector.broadcast %cst_5 : f32 to vector<8x128xf32>
    %9 = arith.addf %8, %7 : vector<8x128xf32>
    %10 = arith.divf %8, %9 : vector<8x128xf32>
    %c0_6 = arith.constant 0 : index
    %c0_7 = arith.constant 0 : index
    %11 = vector.load %arg4[%c0_6, %c0_7] : memref<128x128xf32, #tpu.memory_space<vmem>>, vector<128x128xf32>
    %cst_8 = arith.constant dense<0.000000e+00> : vector<8x128xf32>
    %12 = tpu.matmul %10, %11, %cst_8 {dimension_numbers = #tpu.dot_dimension_numbers<[1], [0], [0], [1], [0, 0, 1, 1], [], []>} : vector<8x128xf32>, vector<128x128xf32>, vector<8x128xf32> -> vector<8x128xf32>
    %c0_9 = arith.constant 0 : index
    %c0_10 = arith.constant 0 : index
    %13 = vector.load %arg5[%c0_9, %c0_10] : memref<1x128xf32, #tpu.memory_space<vmem>>, vector<1x128xf32>
    %14 = vector.broadcast %13 : vector<1x128xf32> to vector<8x128xf32>
    %15 = arith.addf %12, %14 : vector<8x128xf32>
    %16 = arith.negf %15 : vector<8x128xf32>
    %17 = math.exp %16 : vector<8x128xf32>
    %cst_11 = arith.constant 1.000000e+00 : f32
    %18 = vector.broadcast %cst_11 : f32 to vector<8x128xf32>
    %19 = arith.addf %18, %17 : vector<8x128xf32>
    %20 = arith.divf %18, %19 : vector<8x128xf32>
    %c0_12 = arith.constant 0 : index
    %c0_13 = arith.constant 0 : index
    %21 = vector.load %arg6[%c0_12, %c0_13] : memref<128x128xf32, #tpu.memory_space<vmem>>, vector<128x128xf32>
    %cst_14 = arith.constant dense<0.000000e+00> : vector<8x128xf32>
    %22 = tpu.matmul %20, %21, %cst_14 {dimension_numbers = #tpu.dot_dimension_numbers<[1], [0], [0], [1], [0, 0, 1, 1], [], []>} : vector<8x128xf32>, vector<128x128xf32>, vector<8x128xf32> -> vector<8x128xf32>
    %c0_15 = arith.constant 0 : index
    %c0_16 = arith.constant 0 : index
    %23 = vector.load %arg7[%c0_15, %c0_16] : memref<1x128xf32, #tpu.memory_space<vmem>>, vector<1x128xf32>
    %24 = vector.broadcast %23 : vector<1x128xf32> to vector<8x128xf32>
    %25 = arith.addf %22, %24 : vector<8x128xf32>
    %26 = arith.negf %25 : vector<8x128xf32>
    %27 = math.exp %26 : vector<8x128xf32>
    %cst_17 = arith.constant 1.000000e+00 : f32
    %28 = vector.broadcast %cst_17 : f32 to vector<8x128xf32>
    %29 = arith.addf %28, %27 : vector<8x128xf32>
    %30 = arith.divf %28, %29 : vector<8x128xf32>
    %c0_18 = arith.constant 0 : index
    %c0_19 = arith.constant 0 : index
    %31 = vector.load %arg8[%c0_18, %c0_19] : memref<128x128xf32, #tpu.memory_space<vmem>>, vector<128x128xf32>
    %cst_20 = arith.constant dense<0.000000e+00> : vector<8x128xf32>
    %32 = tpu.matmul %30, %31, %cst_20 {dimension_numbers = #tpu.dot_dimension_numbers<[1], [0], [0], [1], [0, 0, 1, 1], [], []>} : vector<8x128xf32>, vector<128x128xf32>, vector<8x128xf32> -> vector<8x128xf32>
    %c0_21 = arith.constant 0 : index
    %c0_22 = arith.constant 0 : index
    %33 = vector.load %arg9[%c0_21, %c0_22] : memref<1x128xf32, #tpu.memory_space<vmem>>, vector<1x128xf32>
    %34 = vector.broadcast %33 : vector<1x128xf32> to vector<8x128xf32>
    %35 = arith.addf %32, %34 : vector<8x128xf32>
    %c0_23 = arith.constant 0 : index
    %c0_24 = arith.constant 0 : index
    %36 = vector.load %arg10[%c0_23, %c0_24] : memref<8x128xf32, #tpu.memory_space<vmem>>, vector<8x128xf32>
    tpu.vector_store %arg10[%c0_23, %c0_24], %35 {strides = array<i32>} : memref<8x128xf32, #tpu.memory_space<vmem>>, vector<8x128xf32>,
    return
  }
  func.func @transform_0(%arg0: i32) -> (i32, i32) {
    %c0_i32 = arith.constant 0 : i32
    %c0_i32_0 = arith.constant 0 : i32
    return %arg0, %c0_i32 : i32, i32
  }
  func.func @transform_1(%arg0: i32) -> (i32, i32) {
    %c0_i32 = arith.constant 0 : i32
    %c0_i32_0 = arith.constant 0 : i32
    %c0_i32_1 = arith.constant 0 : i32
    return %c0_i32, %c0_i32_0 : i32, i32
  }
  func.func @transform_2(%arg0: i32) -> (i32, i32) {
    %c0_i32 = arith.constant 0 : i32
    %c0_i32_0 = arith.constant 0 : i32
    %c0_i32_1 = arith.constant 0 : i32
    return %c0_i32, %c0_i32_0 : i32, i32
  }
  func.func @transform_3(%arg0: i32) -> (i32, i32) {
    %c0_i32 = arith.constant 0 : i32
    %c0_i32_0 = arith.constant 0 : i32
    %c0_i32_1 = arith.constant 0 : i32
    return %c0_i32, %c0_i32_0 : i32, i32
  }
  func.func @transform_4(%arg0: i32) -> (i32, i32) {
    %c0_i32 = arith.constant 0 : i32
    %c0_i32_0 = arith.constant 0 : i32
    %c0_i32_1 = arith.constant 0 : i32
    return %c0_i32, %c0_i32_0 : i32, i32
  }
  func.func @transform_5(%arg0: i32) -> (i32, i32) {
    %c0_i32 = arith.constant 0 : i32
    %c0_i32_0 = arith.constant 0 : i32
    %c0_i32_1 = arith.constant 0 : i32
    return %c0_i32, %c0_i32_0 : i32, i32
  }
  func.func @transform_6(%arg0: i32) -> (i32, i32) {
    %c0_i32 = arith.constant 0 : i32
    %c0_i32_0 = arith.constant 0 : i32
    %c0_i32_1 = arith.constant 0 : i32
    return %c0_i32, %c0_i32_0 : i32, i32
  }
  func.func @transform_7(%arg0: i32) -> (i32, i32) {
    %c0_i32 = arith.constant 0 : i32
    %c0_i32_0 = arith.constant 0 : i32
    %c0_i32_1 = arith.constant 0 : i32
    return %c0_i32, %c0_i32_0 : i32, i32
  }
  func.func @transform_8(%arg0: i32) -> (i32, i32) {
    %c0_i32 = arith.constant 0 : i32
    %c0_i32_0 = arith.constant 0 : i32
    %c0_i32_1 = arith.constant 0 : i32
    return %c0_i32, %c0_i32_0 : i32, i32
  }
  func.func @transform_9(%arg0: i32) -> (i32, i32) {
    %c0_i32 = arith.constant 0 : i32
    %c0_i32_0 = arith.constant 0 : i32
    return %arg0, %c0_i32 : i32, i32
  }
}

</mosaic_0001>

<bundles_post_ra>
// kernel: fd_odn_forward.1
= control target key start
LH: loop header
LB: loop body
LE: loop exit
PB: predicated region body
PF: predicated region fallthrough
CT: control target
= control target key end

     0   :  { %vm45_vm0 = vcmask 1043456   ;;  %vm41_vm1 = vcmask 31744   ;;  %v680_v0 = vmov 0.0   ;;  %vm681_vm2 = vmmov 0   ;;  %s931_s1 = inlined_call_operand.vmem [shape: f32[4,128], index: 1, kind: input, shape index: {}]   ;;  %s932_s0 = inlined_call_operand.vmem [shape: f32[8,4], index: 0, kind: input, shape index: {}]   ;;  %s933_s3 = inlined_call_operand.vmem [shape: f32[128,128], index: 3, kind: input, shape index: {}]   ;;  %s934_s5 = inlined_call_operand.vmem [shape: f32[128,128], index: 5, kind: input, shape index: {}]   ;;  %s935_s2 = inlined_call_operand.vmem [shape: f32[1,128], index: 2, kind: input, shape index: {}]   ;;  %s936_s7 = inlined_call_operand.vmem [shape: f32[128,128], index: 7, kind: input, shape index: {}]   ;;  %s937_s4 = inlined_call_operand.vmem [shape: f32[1,128], index: 4, kind: input, shape index: {}]   ;;  %s938_s6 = inlined_call_operand.vmem [shape: f32[1,128], index: 6, kind: input, shape index: {}]   ;;  %s939_s8 = inlined_call_operand.vmem [shape: f32[1,128], index: 8, kind: input, shape index: {}]   ;;  %s940_s9 = inlined_call_operand.vmem [shape: f32[8,128], index: 9, kind: output, shape index: {}]  }
   0x1   :  { %483 = vmatprep.subr.mxu0 %v680_v0  ;;  %v33_v1 = vld [vmem:[%s931_s1] sm:$0xf]  ;;  %485 = vmatprep.mubr.msk.f32.mxu0 %vm681_vm2, %v680_v0  ;;  %v682_v4 = vmov 0.0|0.0   ;;  %v126_v5 = vld [vmem:[%s933_s3 + $0x8] sm:$0xff]  ;;  %v127_v7 = vld [vmem:[%s933_s3 + $0x10] sm:$0xff] }
   0x2   :  { %v32_v2 = vld [vmem:[%s932_s0] sm:$0xff]  ;;  %484 = vmatpush3.msk.msra.mxu0 %vm45_vm0, %v33_v1  ;;  %593 = vmatprep.subr.bf16.mxu1 %v682_v4  ;;  %v128_v8 = vld [vmem:[%s933_s3 + $0x18] sm:$0xff]  ;;  %v130_v11 = vld [vmem:[%s933_s3 + $0x28] sm:$0xff] }
   0x3   :  { %v125_v3 = vld [vmem:[%s933_s3] sm:$0xff]  ;;  %486 = vmatmul.mubr.msk.f32.vlgmr.msra.gmra.mrb[0].mxu0 %vm41_vm1, %v32_v2  ;;  %520 = vmatprep.mubr.msk.f32.mxu1 %vm681_vm2, %v680_v0  ;;  %v597_v9 = vpack.c.bf16 %v128_v8, %v127_v7  ;;  %v131_v13 = vld [vmem:[%s933_s3 + $0x30] sm:$0xff]  ;;  %v132_v14 = vld [vmem:[%s933_s3 + $0x38] sm:$0xff] }
   0x4   :  { %v594_v6 = vpack.c.bf16 %v126_v5, %v125_v3  ;;  %617 = vmatprep.subr.bf16.mxu0 %v682_v4  ;;  %555 = vmatprep.mubr.msk.f32.mxu0 %vm681_vm2, %v680_v0  ;;  %v129_v10 = vld [vmem:[%s933_s3 + $0x20] sm:$0xff]  ;;  %v603_v15 = vpack.c.bf16 %v132_v14, %v131_v13  ;;  %v134_v17 = vld [vmem:[%s933_s3 + $0x48] sm:$0xff]  ;;  %v135_v19 = vld [vmem:[%s933_s3 + $0x50] sm:$0xff] }
   0x5   :  { %v600_v12 = vpack.c.bf16 %v130_v11, %v129_v10  ;;  %v133_v16 = vld [vmem:[%s933_s3 + $0x40] sm:$0xff]  ;;  %v136_v20 = vld [vmem:[%s933_s3 + $0x58] sm:$0xff]  ;;  %v138_v23 = vld [vmem:[%s933_s3 + $0x68] sm:$0xff] }
   0x6   :  { %595 = vmatpush3.bf16.msra.mxu1 %v594_v6  ;;  %v606_v18 = vpack.c.bf16 %v134_v17, %v133_v16  ;;  %v609_v21 = vpack.c.bf16 %v136_v20, %v135_v19  ;;  %v137_v22 = vld [vmem:[%s933_s3 + $0x60] sm:$0xff]  ;;  %v139_v25 = vld [vmem:[%s933_s3 + $0x70] sm:$0xff]  ;;  %v140_v26 = vld [vmem:[%s933_s3 + $0x78] sm:$0xff] }
   0x7   :  { %596 = vmatprep.subr.bf16.mxu1 %v682_v4  ;;  %v612_v24 = vpack.c.bf16 %v138_v23, %v137_v22  ;;  %v615_v27 = vpack.c.bf16 %v140_v26, %v139_v25  ;;  %v224_v28 = vld [vmem:[%s934_s5] sm:$0xff]  ;;  %v225_v29 = vld [vmem:[%s934_s5 + $0x8] sm:$0xff]  ;;  %v226_v39 = vld [vmem:[%s934_s5 + $0x10] sm:$0xff] }
   0x8   :  { %v618_v30 = vpack.c.bf16 %v225_v29, %v224_v28  ;;  %v421_v31 = vld [vmem:[%s935_s2] ss:$0 sm:$0xff]  ;;  %v227_v40 = vld [vmem:[%s934_s5 + $0x18] sm:$0xff]  ;;  %v229_v43 = vld [vmem:[%s934_s5 + $0x28] sm:$0xff] }
   0x9   :  { %v621_v41 = vpack.c.bf16 %v227_v40, %v226_v39  ;;  %v228_v42 = vld [vmem:[%s934_s5 + $0x20] sm:$0xff]  ;;  %v230_v45 = vld [vmem:[%s934_s5 + $0x30] sm:$0xff]  ;;  %v231_v46 = vld [vmem:[%s934_s5 + $0x38] sm:$0xff] }
   0xa   :  { %598 = vmatpush3.bf16.msra.mxu1 %v597_v9  ;;  %619 = vmatpush3.bf16.msra.mxu0 %v618_v30  ;;  %v624_v44 = vpack.c.bf16 %v229_v43, %v228_v42  ;;  %v627_v47 = vpack.c.bf16 %v231_v46, %v230_v45  ;;  %v232_v48 = vld [vmem:[%s934_s5 + $0x40] sm:$0xff]  ;;  %v233_v49 = vld [vmem:[%s934_s5 + $0x48] sm:$0xff]  ;;  %v234_v51 = vld [vmem:[%s934_s5 + $0x50] sm:$0xff] }
   0xb   :  { %599 = vmatprep.subr.bf16.mxu1 %v682_v4  ;;  %620 = vmatprep.subr.bf16.mxu0 %v682_v4  ;;  %v630_v50 = vpack.c.bf16 %v233_v49, %v232_v48  ;;  %v235_v52 = vld [vmem:[%s934_s5 + $0x58] sm:$0xff]  ;;  %v236_v54 = vld [vmem:[%s934_s5 + $0x60] sm:$0xff]  ;;  %v237_v55 = vld [vmem:[%s934_s5 + $0x68] sm:$0xff] }
   0xc   :  { %v633_v53 = vpack.c.bf16 %v235_v52, %v234_v51  ;;  %v636_v56 = vpack.c.bf16 %v237_v55, %v236_v54  ;;  %v238_v57 = vld [vmem:[%s934_s5 + $0x70] sm:$0xff]  ;;  %v239_v58 = vld [vmem:[%s934_s5 + $0x78] sm:$0xff]  ;;  %v323_v60 = vld [vmem:[%s936_s7] sm:$0xff] }
   0xd   :  { %v639_v59 = vpack.c.bf16 %v239_v58, %v238_v57  ;;  %v324_v61 = vld [vmem:[%s936_s7 + $0x8] sm:$0xff]  ;;  %v425_v63 = vld [vmem:[%s937_s4] ss:$0 sm:$0xff]  ;;  %v325_v8 = vld [vmem:[%s936_s7 + $0x10] sm:$0xff] }
   0xe   :  { %601 = vmatpush3.bf16.msra.mxu1 %v600_v12  ;;  %622 = vmatpush3.bf16.msra.mxu0 %v621_v41  ;;  %v642_v62 = vpack.c.bf16 %v324_v61, %v323_v60  ;;  %v326_v9 = vld [vmem:[%s936_s7 + $0x18] sm:$0xff]  ;;  %v327_v11 = vld [vmem:[%s936_s7 + $0x20] sm:$0xff]  ;;  %v328_v12 = vld [vmem:[%s936_s7 + $0x28] sm:$0xff] }
   0xf   :  { %602 = vmatprep.subr.bf16.mxu1 %v682_v4  ;;  %623 = vmatprep.subr.bf16.mxu0 %v682_v4  ;;  %v645_v10 = vpack.c.bf16 %v326_v9, %v325_v8  ;;  %v648_v13 = vpack.c.bf16 %v328_v12, %v327_v11  ;;  %v329_v14 = vld [vmem:[%s936_s7 + $0x30] sm:$0xff]  ;;  %v331_v17 = vld [vmem:[%s936_s7 + $0x40] sm:$0xff] }
  0x10   :  { %v333_v20 = vld [vmem:[%s936_s7 + $0x50] sm:$0xff]  ;;  %v335_v23 = vld [vmem:[%s936_s7 + $0x60] sm:$0xff] }
  0x11   :  { %v337_v26 = vld [vmem:[%s936_s7 + $0x70] sm:$0xff]  ;;  %v427_v29 = vld [vmem:[%s938_s6] ss:$0 sm:$0xff] }
  0x12   :  { %604 = vmatpush3.bf16.msra.mxu1 %v603_v15  ;;  %625 = vmatpush3.bf16.msra.mxu0 %v624_v44  ;;  %v330_v15 = vld [vmem:[%s936_s7 + $0x38] sm:$0xff] }
  0x13   :  { %605 = vmatprep.subr.bf16.mxu1 %v682_v4  ;;  %626 = vmatprep.subr.bf16.mxu0 %v682_v4  ;;  %v651_v16 = vpack.c.bf16 %v330_v15, %v329_v14 }
  0x16   :  { %607 = vmatpush3.bf16.msra.mxu1 %v606_v18  ;;  %628 = vmatpush3.bf16.msra.mxu0 %v627_v47  ;;  %v332_v18 = vld [vmem:[%s936_s7 + $0x48] sm:$0xff] }
  0x17   :  { %608 = vmatprep.subr.bf16.mxu1 %v682_v4  ;;  %629 = vmatprep.subr.bf16.mxu0 %v682_v4  ;;  %v654_v19 = vpack.c.bf16 %v332_v18, %v331_v17 }
  0x1a   :  { %610 = vmatpush3.bf16.msra.mxu1 %v609_v21  ;;  %631 = vmatpush3.bf16.msra.mxu0 %v630_v50  ;;  %v334_v21 = vld [vmem:[%s936_s7 + $0x58] sm:$0xff] }
  0x1b   :  { %611 = vmatprep.subr.bf16.mxu1 %v682_v4  ;;  %632 = vmatprep.subr.bf16.mxu0 %v682_v4  ;;  %v657_v22 = vpack.c.bf16 %v334_v21, %v333_v20 }
  0x1e   :  { %613 = vmatpush3.bf16.msra.mxu1 %v612_v24  ;;  %634 = vmatpush3.bf16.msra.mxu0 %v633_v53  ;;  %v336_v24 = vld [vmem:[%s936_s7 + $0x68] sm:$0xff] }
  0x1f   :  { %614 = vmatprep.subr.bf16.mxu1 %v682_v4  ;;  %635 = vmatprep.subr.bf16.mxu0 %v682_v4  ;;  %v660_v25 = vpack.c.bf16 %v336_v24, %v335_v23 }
  0x22   :  { %616 = vmatpush3.bf16.msra.mxu1 %v615_v27  ;;  %637 = vmatpush3.bf16.msra.mxu0 %v636_v56  ;;  %v338_v27 = vld [vmem:[%s936_s7 + $0x78] sm:$0xff] }
  0x23   :  { %641 = vmatprep.subr.bf16.mxu1 %v682_v4  ;;  %638 = vmatprep.subr.bf16.mxu0 %v682_v4  ;;  %v663_v28 = vpack.c.bf16 %v338_v27, %v337_v26 }
  0x26   :  { %640 = vmatpush3.bf16.msra.mxu0 %v639_v59 }
  0xd6   :  { %v115_v32 = vpop.f32.mrb[0].mxu0 }
  0xd7   :  { %v116_v33 = vadd.f32 %v421_v31, %v115_v32  ;;  %v487_v34 = vpop.f32.mrb[1].mxu0 }
  0xd9   :  { %v424_v35 = vmul.f32 -1.442695, %v116_v33 }
  0xdb   :  { %668 = vpow2.f32 %v424_v35 }
  0xe5   :  { %v669_v36 = vpop.eup %668 }
  0xe6   :  { %v122_v37 = vadd.f32 1.0, %v669_v36 }
  0xe8   :  { %670 = vrcp.f32 %v122_v37  ;;  %v429_v37 = vld [vmem:[%s939_s8] ss:$0 sm:$0xff] }
  0xf2   :  { %v671_v38 = vpop.eup %670 }
  0xf3   :  { %521 = vmatmul.mubr.f32.vlgmr.msra.gmra.mrb[0].mxu1 %v671_v38 }
  0xf4   :  { %590 = vmatprep.mubr.msk.f32.mxu1 %vm681_vm2, %v680_v0  ;;  %643 = vmatpush3.bf16.msra.mxu1 %v642_v62 }
  0xf5   :  { %644 = vmatprep.subr.bf16.mxu1 %v682_v4 }
  0xf8   :  { %646 = vmatpush3.bf16.msra.mxu1 %v645_v10 }
  0xf9   :  { %647 = vmatprep.subr.bf16.mxu1 %v682_v4 }
  0xfc   :  { %649 = vmatpush3.bf16.msra.mxu1 %v648_v13 }
  0xfd   :  { %650 = vmatprep.subr.bf16.mxu1 %v682_v4 }
 0x100   :  { %652 = vmatpush3.bf16.msra.mxu1 %v651_v16 }
 0x101   :  { %653 = vmatprep.subr.bf16.mxu1 %v682_v4 }
 0x104   :  { %655 = vmatpush3.bf16.msra.mxu1 %v654_v19 }
 0x105   :  { %656 = vmatprep.subr.bf16.mxu1 %v682_v4 }
 0x108   :  { %658 = vmatpush3.bf16.msra.mxu1 %v657_v22 }
 0x109   :  { %659 = vmatprep.subr.bf16.mxu1 %v682_v4 }
 0x10c   :  { %661 = vmatpush3.bf16.msra.mxu1 %v660_v25 }
 0x10d   :  { %662 = vmatprep.subr.bf16.mxu1 %v682_v4 }
 0x110   :  { %664 = vmatpush3.bf16.msra.mxu1 %v663_v28 }
 0x1c6   :  { %v214_v0 = vpop.f32.mrb[0].mxu1 }
 0x1c7   :  { %v215_v1 = vadd.f32 %v425_v63, %v214_v0  ;;  %v522_v2 = vpop.f32.mrb[1].mxu1 }
 0x1c9   :  { %v426_v3 = vmul.f32 -1.442695, %v215_v1 }
 0x1cb   :  { %672 = vpow2.f32 %v426_v3 }
 0x1d5   :  { %v673_v5 = vpop.eup %672 }
 0x1d6   :  { %v221_v6 = vadd.f32 1.0, %v673_v5 }
 0x1d8   :  { %674 = vrcp.f32 %v221_v6 }
 0x1e2   :  { %v675_v7 = vpop.eup %674 }
 0x1e3   :  { %556 = vmatmul.mubr.f32.vlgmr.msra.gmra.mrb[2].mxu0 %v675_v7 }
 0x2b6   :  { %v313_v30 = vpop.f32.mrb[2].mxu0 }
 0x2b7   :  { %v314_v31 = vadd.f32 %v427_v29, %v313_v30  ;;  %v557_v32 = vpop.f32.mrb[3].mxu0 }
 0x2b9   :  { %v428_v33 = vmul.f32 -1.442695, %v314_v31 }
 0x2bb   :  { %676 = vpow2.f32 %v428_v33 }
 0x2c5   :  { %v677_v34 = vpop.eup %676 }
 0x2c6   :  { %v320_v35 = vadd.f32 1.0, %v677_v34 }
 0x2c8   :  { %678 = vrcp.f32 %v320_v35 }
 0x2d2   :  { %v679_v36 = vpop.eup %678 }
 0x2d3   :  { %591 = vmatmul.mubr.f32.vlgmr.msra.gmra.mrb[2].mxu1 %v679_v36 }
 0x3a6   :  { %v412_v4 = vpop.f32.mrb[2].mxu1 }
 0x3a7   :  { %v413_v38 = vadd.f32 %v429_v37, %v412_v4  ;;  %v592_v39 = vpop.f32.mrb[3].mxu1 }
 0x3a9   :  { %416 = vst [vmem:[%s940_s9] sm:$0xff] %v413_v38 }

</bundles_post_ra>
